<compile_context>
chip_gen: v7x
topology: tpu7x:2x2x1
jax: 0.10.0
libtpu: 0.0.40
codegen_flags: <defaults>
</compile_context>

<pallas_src>
import functools

import jax
import jax.numpy as jnp
from jax.experimental import pallas as pl
from jax.experimental.pallas import tpu as pltpu


# ----------------------------------------------------------------------------- kernels


def _rbf_kernel_general(scale_ref, x1_ref, x2_ref, sq1_ref, sq2_ref, out_ref):
    """out[i, j] = exp(scale * ||x1[i] - x2[j]||^2), scale = -0.5 / ls^2 (general D)."""
    x1 = x1_ref[...]  # (tm, d) f32
    x2 = x2_ref[...]  # (tn, d) f32

    # x1 @ x2^T as a trans-B contraction on the MXU (no transpose of x2 anywhere).
    cross = jax.lax.dot_general(
        x1, x2, (((1,), (1,)), ((), ())), preferred_element_type=jnp.float32
    )  # (tm, tn)

    # Hoisted row norms: sq1 is (tm, 1), sq2 is already lane-dense (1, tn).
    sqdist = jnp.maximum(sq1_ref[...] + sq2_ref[...] - 2.0 * cross, 0.0)

    out_ref[...] = jnp.exp(scale_ref[0] * sqdist).astype(out_ref.dtype)


def _rbf_kernel_d1(scale_ref, x1_ref, x2row_ref, out_ref):
    """D == 1 fast path: direct squared difference on the VPU (no MXU, no expansion)."""
    diff = x1_ref[...] - x2row_ref[...]  # (tm, 1) - (1, tn) -> (tm, tn)
    out_ref[...] = jnp.exp(scale_ref[0] * (diff * diff)).astype(out_ref.dtype)


# ----------------------------------------------------------------------------- helpers


def _round_up(x, m):
    return ((x + m - 1) // m) * m


def _pick_tile(n_pad, align, cap):
    """Pick (tile, n_final) with tile % align == 0, tile <= max(cap, align),
    tile dividing n_final >= n_pad, preferring zero extra padding."""
    cap = max(align, (cap // align) * align)
    if n_pad <= cap:
        return n_pad, n_pad                      # single block, no extra padding
    best = 0
    t = cap
    while t >= align:                            # largest aligned divisor of n_pad
        if n_pad % t == 0:
            best = t
            break
        t -= align
    if best * 4 >= cap:                          # divisor is big enough -> no padding
        return best, n_pad
    n_final = _round_up(n_pad, cap)              # else bounded padding (< cap extra)
    return cap, n_final


# ----------------------------------------------------------------------------- wrapper


@functools.partial(jax.jit, static_argnames=("tile_m", "tile_n", "out_dtype"))
def rbf_kernel_forward(X1, X2, length_scale, *, tile_m=512, tile_n=1024,
                       out_dtype=jnp.float32):
    """Pallas equivalent of RBFKernel(length_scale).forward(X1, X2)."""
    n1, d = X1.shape
    n2, d2 = X2.shape
    assert d == d2, "feature dims must match"

    X1 = X1.astype(jnp.float32)
    X2 = X2.astype(jnp.float32)

    # ---- minimal alignment padding: rows -> 8 (sublane), cols -> 128 (lane) ----
    n1p = _round_up(n1, 8)
    n2p = _round_up(n2, 128)

    # ---- VMEM-budget-aware tile caps (safe on v7x 64 MiB phys / 32 MiB scoped) ----
    vmem_budget = 20 * 1024 * 1024  # bytes for all double-buffered f32 tiles
    tm_cap = max(8, (tile_m // 8) * 8)
    tn_cap = max(128, (tile_n // 128) * 128)
    while 8 * (tm_cap * d + tn_cap * d + tm_cap * tn_cap + tm_cap + tn_cap) > vmem_budget:
        if tn_cap > 128 and tn_cap >= tm_cap:
            tn_cap //= 2
        elif tm_cap > 8:
            tm_cap //= 2
        else:
            break

    tm, n1f = _pick_tile(n1p, 8, tm_cap)
    tn, n2f = _pick_tile(n2p, 128, tn_cap)

    if n1f != n1:
        X1 = jnp.pad(X1, ((0, n1f - n1), (0, 0)))
    if n2f != n2:
        X2 = jnp.pad(X2, ((0, n2f - n2), (0, 0)))

    # -0.5 / ls^2 folded once into a single SMEM scalar.
    ls = jnp.asarray(length_scale, jnp.float32)
    neg_half_inv_ls_sq = jnp.reshape(-0.5 / (ls * ls), (1,))

    grid = (n1f // tm, n2f // tn)
    compiler_params = pltpu.CompilerParams(
        dimension_semantics=("parallel", "parallel"),   # megacore sharding on v7x
        vmem_limit_bytes=32 * 1024 * 1024,
    )

    if d == 1:
        # D == 1 fast path: pass X2 as a lane-dense row and diff directly.
        x2_row = X2.T  # (1, n2f)
        out = pl.pallas_call(
            _rbf_kernel_d1,
            out_shape=jax.ShapeDtypeStruct((n1f, n2f), out_dtype),
            grid=grid,
            in_specs=[
                pl.BlockSpec(memory_space=pltpu.MemorySpace.SMEM),  # [-0.5 / ls^2]
                pl.BlockSpec((tm, 1), lambda i, j: (i, 0)),          # X1 column tile
                pl.BlockSpec((1, tn), lambda i, j: (0, j)),          # X2 row tile
            ],
            out_specs=pl.BlockSpec((tm, tn), lambda i, j: (i, j)),
            compiler_params=compiler_params,
        )(neg_half_inv_ls_sq, X1, x2_row)
    else:
        # General D: hoisted row norms + trans-B MXU contraction in the kernel.
        sq1 = jnp.sum(X1 * X1, axis=-1, keepdims=True)           # (n1f, 1)
        sq2_row = jnp.sum(X2 * X2, axis=-1, keepdims=True).T     # (1, n2f) lane-dense
        out = pl.pallas_call(
            _rbf_kernel_general,
            out_shape=jax.ShapeDtypeStruct((n1f, n2f), out_dtype),
            grid=grid,
            in_specs=[
                pl.BlockSpec(memory_space=pltpu.MemorySpace.SMEM),  # [-0.5 / ls^2]
                pl.BlockSpec((tm, d), lambda i, j: (i, 0)),          # X1 row tile
                pl.BlockSpec((tn, d), lambda i, j: (j, 0)),          # X2 row tile
                pl.BlockSpec((tm, 1), lambda i, j: (i, 0)),          # ||x1||^2 tile
                pl.BlockSpec((1, tn), lambda i, j: (0, j)),          # ||x2||^2 row tile
            ],
            out_specs=pl.BlockSpec((tm, tn), lambda i, j: (i, j)),
            compiler_params=compiler_params,
        )(neg_half_inv_ls_sq, X1, X2, sq1, sq2_row)

    if n1f != n1 or n2f != n2:
        out = out[:n1, :n2]
    return out


# ----------------------------------------------------------------------------- main

if __name__ == "__main__":
    key = jax.random.PRNGKey(0)
    k1, k2, k3, k4 = jax.random.split(key, 4)

    def ref_rbf(a, b, ls):
        diff = a[:, None, :] - b[None, :, :]
        sqdist = jnp.sum(diff * diff, axis=-1) / (ls * ls)
        return jnp.exp(-0.5 * sqdist)

    # 1-D points, as in the source control script (D = 1); exercises the D==1 fast
    # path plus the minimal (8 / 128) padding + slice-back logic.
    length_scale = 1.3
    X1 = jax.random.uniform(k1, (300, 1), jnp.float32, minval=-3.0, maxval=3.0)
    X2 = jax.random.uniform(k2, (260, 1), jnp.float32, minval=-3.0, maxval=3.0)

    out = rbf_kernel_forward(X1, X2, length_scale)
    jax.block_until_ready(out)
    ref = ref_rbf(X1, X2, jnp.float32(length_scale))
    assert out.shape == (300, 260)
    assert jnp.allclose(out, ref, atol=1e-5, rtol=1e-5), float(
        jnp.max(jnp.abs(out - ref))
    )

    # General-D path (hoisted norms + MXU cross term).
    A = jax.random.normal(k3, (96, 4), jnp.float32)
    B = jax.random.normal(k4, (40, 4), jnp.float32)
    out2 = rbf_kernel_forward(A, B, 0.7)
    jax.block_until_ready(out2)
    ref2 = ref_rbf(A, B, jnp.float32(0.7))
    assert jnp.allclose(out2, ref2, atol=1e-5, rtol=1e-5), float(
        jnp.max(jnp.abs(out2 - ref2))
    )

    # Optional bf16 output mode (math in f32, cast after exp) for write-bound chips.
    out3 = rbf_kernel_forward(X1, X2, length_scale, out_dtype=jnp.bfloat16)
    jax.block_until_ready(out3)
    assert out3.dtype == jnp.bfloat16
    assert jnp.allclose(out3.astype(jnp.float32), ref, atol=1e-2, rtol=1e-2)

    print("KERNEL_OK")
</pallas_src>

<mosaic_0001>
module attributes {stable_mosaic.version = 11 : i64} {
  func.func @_rbf_kernel_d1(%arg0: i32, %arg1: i32, %arg2: memref<1xf32, #tpu.memory_space<smem>>, %arg3: memref<304x1xf32, #tpu.memory_space<vmem>>, %arg4: memref<1x384xf32, #tpu.memory_space<vmem>>, %arg5: memref<304x384xf32, #tpu.memory_space<vmem>>) attributes {dimension_semantics = [#tpu.dimension_semantics<parallel>, #tpu.dimension_semantics<parallel>], iteration_bounds = array<i64: 1, 1>, scalar_prefetch = 0 : i64, scratch_operands = 0 : i64, tpu.core_type = #tpu.core_type<tc>, window_params = [{transform_indices = @transform_0, window_bounds = array<i64: 1>}, {transform_indices = @transform_1, window_bounds = array<i64: 304, 1>}, {transform_indices = @transform_2, window_bounds = array<i64: 1, 384>}, {transform_indices = @transform_3, window_bounds = array<i64: 304, 384>}]} {
    %c0 = arith.constant 0 : index
    %c0_0 = arith.constant 0 : index
    %0 = vector.load %arg3[%c0, %c0_0] : memref<304x1xf32, #tpu.memory_space<vmem>>, vector<304x1xf32>
    %c0_1 = arith.constant 0 : index
    %c0_2 = arith.constant 0 : index
    %1 = vector.load %arg4[%c0_1, %c0_2] : memref<1x384xf32, #tpu.memory_space<vmem>>, vector<1x384xf32>
    %2 = vector.broadcast %0 : vector<304x1xf32> to vector<304x384xf32>
    %3 = vector.broadcast %1 : vector<1x384xf32> to vector<304x384xf32>
    %4 = arith.subf %2, %3 : vector<304x384xf32>
    %c0_3 = arith.constant 0 : index
    %5 = memref.load %arg2[%c0_3] : memref<1xf32, #tpu.memory_space<smem>>
    %6 = arith.mulf %4, %4 : vector<304x384xf32>
    %7 = vector.broadcast %5 : f32 to vector<304x384xf32>
    %8 = arith.mulf %7, %6 : vector<304x384xf32>
    %9 = math.exp %8 : vector<304x384xf32>
    %c0_4 = arith.constant 0 : index
    %c0_5 = arith.constant 0 : index
    %10 = vector.load %arg5[%c0_4, %c0_5] : memref<304x384xf32, #tpu.memory_space<vmem>>, vector<304x384xf32>
    tpu.vector_store %arg5[%c0_4, %c0_5], %9 {strides = array<i32>} : memref<304x384xf32, #tpu.memory_space<vmem>>, vector<304x384xf32>,
    return
  }
  func.func @transform_0(%arg0: i32, %arg1: i32) -> i32 {
    %c0_i32 = arith.constant 0 : i32
    %c0_i32_0 = arith.constant 0 : i32
    return %c0_i32 : i32
  }
  func.func @transform_1(%arg0: i32, %arg1: i32) -> (i32, i32) {
    %c0_i32 = arith.constant 0 : i32
    %c0_i32_0 = arith.constant 0 : i32
    return %arg0, %c0_i32 : i32, i32
  }
  func.func @transform_2(%arg0: i32, %arg1: i32) -> (i32, i32) {
    %c0_i32 = arith.constant 0 : i32
    %c0_i32_0 = arith.constant 0 : i32
    return %c0_i32, %arg1 : i32, i32
  }
  func.func @transform_3(%arg0: i32, %arg1: i32) -> (i32, i32) {
    %c0_i32 = arith.constant 0 : i32
    return %arg0, %arg1 : i32, i32
  }
}

</mosaic_0001>

<bundles_post_ra>
// kernel: rbf_kernel_forward.1
= control target key start
LH: loop header
LB: loop body
LE: loop exit
PB: predicated region body
PF: predicated region fallthrough
CT: control target
= control target key end

     0   :  { %v1181_v0 = vmov 0   ;;  %v245_v39 = vlaneseq  ;;  %s1900_s1 = inlined_call_operand.vmem [shape: f32[304,1], index: 1, kind: input, shape index: {}]   ;;  %s1901_s2 = inlined_call_operand.vmem [shape: f32[1,384], index: 2, kind: input, shape index: {}]   ;;  %s1902_s0 = inlined_call_operand.<no memory space> [shape: f32[1], index: 0, kind: input, shape index: {}]   ;;  %s1903_s3 = inlined_call_operand.vmem [shape: f32[304,384], index: 3, kind: output, shape index: {}]  }
   0x1   :  { %952 = vset.pattern.permute.xlu1 %v1181_v0  ;;  %951 = vset.pattern.permute.xlu0 %v1181_v0  ;;  %v17_v1 = vld [vmem:[%s1900_s1 + $0x10] sm:$0xff]  ;;  %v15_v2 = vld [vmem:[%s1900_s1] sm:$0xff]  ;;  %v18_v3 = vld [vmem:[%s1900_s1 + $0x18] sm:$0xff]  ;;  %v1332_v54 = vstv %s1902_s0 }
   0x2   :  { %66 = vperm.xlu1 %952, %v17_v1   ;;  %56 = vperm.xlu0 %951, %v15_v2   ;;  %v16_v4 = vld [vmem:[%s1900_s1 + $0x8] sm:$0xff]  ;;  %v19_v6 = vld [vmem:[%s1900_s1 + $0x20] sm:$0xff]  ;;  %v22_v7 = vld [vmem:[%s1900_s1 + $0x38] sm:$0xff]  ;;  %v246_v40 = vshrl.u32 %v245_v39, 7 }
   0x3   :  { %v20_v5 = vld [vmem:[%s1900_s1 + $0x28] sm:$0xff]  ;;  %v21_v8 = vld [vmem:[%s1900_s1 + $0x30] sm:$0xff]  ;;  %v23_v10 = vld [vmem:[%s1900_s1 + $0x40] sm:$0xff] }
   0x4   :  { %v24_v9 = vld [vmem:[%s1900_s1 + $0x48] sm:$0xff]  ;;  %v26_v11 = vld [vmem:[%s1900_s1 + $0x58] sm:$0xff]  ;;  %v25_v12 = vld [vmem:[%s1900_s1 + $0x50] sm:$0xff]  ;;  %v247_v41 = vsub.s32 0, %v246_v40  ;;  %v251_v42 = vsub.s32 1, %v246_v40  ;;  %v255_v43 = vsub.s32 2, %v246_v40 }
   0x5   :  { %v28_v13 = vld [vmem:[%s1900_s1 + $0x68] sm:$0xff]  ;;  %v27_v14 = vld [vmem:[%s1900_s1 + $0x60] sm:$0xff]  ;;  %v30_v15 = vld [vmem:[%s1900_s1 + $0x78] sm:$0xff] }
   0x6   :  { %71 = vperm.xlu1 %952, %v18_v3   ;;  %61 = vperm.xlu0 %951, %v16_v4   ;;  %v29_v16 = vld [vmem:[%s1900_s1 + $0x70] sm:$0xff]  ;;  %v32_v17 = vld [vmem:[%s1900_s1 + $0x88] sm:$0xff]  ;;  %v31_v18 = vld [vmem:[%s1900_s1 + $0x80] sm:$0xff] }
   0x7   :  { %v34_v19 = vld [vmem:[%s1900_s1 + $0x98] sm:$0xff]  ;;  %v33_v20 = vld [vmem:[%s1900_s1 + $0x90] sm:$0xff]  ;;  %v36_v21 = vld [vmem:[%s1900_s1 + $0xa8] sm:$0xff] }
   0x8   :  { %v35_v22 = vld [vmem:[%s1900_s1 + $0xa0] sm:$0xff]  ;;  %v38_v23 = vld [vmem:[%s1900_s1 + $0xb8] sm:$0xff]  ;;  %v37_v24 = vld [vmem:[%s1900_s1 + $0xb0] sm:$0xff] }
   0x9   :  { %v40_v25 = vld [vmem:[%s1900_s1 + $0xc8] sm:$0xff]  ;;  %v39_v26 = vld [vmem:[%s1900_s1 + $0xc0] sm:$0xff]  ;;  %v42_v27 = vld [vmem:[%s1900_s1 + $0xd8] sm:$0xff] }
   0xa   :  { %81 = vperm.xlu1 %952, %v20_v5   ;;  %76 = vperm.xlu0 %951, %v19_v6   ;;  %v41_v28 = vld [vmem:[%s1900_s1 + $0xd0] sm:$0xff]  ;;  %v44_v29 = vld [vmem:[%s1900_s1 + $0xe8] sm:$0xff]  ;;  %v43_v30 = vld [vmem:[%s1900_s1 + $0xe0] sm:$0xff] }
   0xb   :  { %v46_v31 = vld [vmem:[%s1900_s1 + $0xf8] sm:$0xff]  ;;  %v45_v32 = vld [vmem:[%s1900_s1 + $0xf0] sm:$0xff]  ;;  %v48_v33 = vld [vmem:[%s1900_s1 + $0x108] sm:$0xff] }
   0xc   :  { %v47_v34 = vld [vmem:[%s1900_s1 + $0x100] sm:$0xff]  ;;  %v50_v35 = vld [vmem:[%s1900_s1 + $0x118] sm:$0xff]  ;;  %v49_v36 = vld [vmem:[%s1900_s1 + $0x110] sm:$0xff] }
   0xd   :  { %v52_v37 = vld [vmem:[%s1900_s1 + $0x128] sm:$0xff]  ;;  %v51_v38 = vld [vmem:[%s1900_s1 + $0x120] sm:$0xff] }
   0xe   :  { %91 = vperm.xlu1 %952, %v22_v7   ;;  %86 = vperm.xlu0 %951, %v21_v8   ;;  %v53_v44 = vld [vmem:[%s1901_s2] sm:$0x7] }
   0xf   :  { %v1319_v45 = vrot.slane %v53_v44, %v247_v41  ;;  %v1321_v46 = vrot.slane %v53_v44, %v251_v42  ;;  %v1323_v47 = vrot.slane %v53_v44, %v255_v43 }
  0x12   :  { %101 = vperm.xlu1 %952, %v24_v9   ;;  %96 = vperm.xlu0 %951, %v23_v10  }
  0x16   :  { %111 = vperm.xlu1 %952, %v26_v11   ;;  %106 = vperm.xlu0 %951, %v25_v12  }
  0x1a   :  { %121 = vperm.xlu1 %952, %v28_v13   ;;  %116 = vperm.xlu0 %951, %v27_v14  }
  0x1e   :  { %131 = vperm.xlu1 %952, %v30_v15   ;;  %126 = vperm.xlu0 %951, %v29_v16  }
  0x22   :  { %141 = vperm.xlu1 %952, %v32_v17   ;;  %136 = vperm.xlu0 %951, %v31_v18  }
  0x26   :  { %151 = vperm.xlu1 %952, %v34_v19   ;;  %146 = vperm.xlu0 %951, %v33_v20  }
  0x2a   :  { %161 = vperm.xlu1 %952, %v36_v21   ;;  %156 = vperm.xlu0 %951, %v35_v22  }
  0x2e   :  { %171 = vperm.xlu1 %952, %v38_v23   ;;  %166 = vperm.xlu0 %951, %v37_v24  }
  0x32   :  { %181 = vperm.xlu1 %952, %v40_v25   ;;  %176 = vperm.xlu0 %951, %v39_v26  }
  0x36   :  { %191 = vperm.xlu1 %952, %v42_v27   ;;  %186 = vperm.xlu0 %951, %v41_v28  }
  0x3a   :  { %201 = vperm.xlu1 %952, %v44_v29   ;;  %196 = vperm.xlu0 %951, %v43_v30  }
  0x3e   :  { %211 = vperm.xlu1 %952, %v46_v31   ;;  %206 = vperm.xlu0 %951, %v45_v32  }
  0x42   :  { %221 = vperm.xlu1 %952, %v48_v33   ;;  %216 = vperm.xlu0 %951, %v47_v34  }
  0x46   :  { %231 = vperm.xlu1 %952, %v50_v35   ;;  %226 = vperm.xlu0 %951, %v49_v36  }
  0x4a   :  { %241 = vperm.xlu1 %952, %v52_v37   ;;  %236 = vperm.xlu0 %951, %v51_v38  }
  0x81   :  { %v67_v48 = vpop.permute.xlu1 %66  ;;  %v57_v49 = vpop.permute.xlu0 %56 }
  0x82   :  { %v266_v50 = vsub.f32 %v67_v48, %v1319_v45  ;;  %v267_v51 = vsub.f32 %v67_v48, %v1321_v46  ;;  %v268_v52 = vsub.f32 %v67_v48, %v1323_v47  ;;  %v260_v53 = vsub.f32 %v57_v49, %v1319_v45 }
  0x83   :  { %v261_v55 = vsub.f32 %v57_v49, %v1321_v46  ;;  %v262_v56 = vsub.f32 %v57_v49, %v1323_v47 }
  0x84   :  { %v381_v57 = vmul.f32 %v266_v50, %v266_v50  ;;  %v382_v58 = vmul.f32 %v267_v51, %v267_v51  ;;  %v383_v59 = vmul.f32 %v268_v52, %v268_v52  ;;  %v375_v60 = vmul.f32 %v260_v53, %v260_v53 }
  0x85   :  { %v376_v61 = vmul.f32 %v261_v55, %v261_v55  ;;  %v377_v62 = vmul.f32 %v262_v56, %v262_v56  ;;  %v72_v63 = vpop.permute.xlu1 %71  ;;  %v62_v8 = vpop.permute.xlu0 %61 }
  0x86   :  { %v496_v0 = vmul.f32 %v1332_v54, %v381_v57  ;;  %v497_v1 = vmul.f32 %v1332_v54, %v382_v58  ;;  %v498_v2 = vmul.f32 %v1332_v54, %v383_v59  ;;  %v490_v3 = vmul.f32 %v1332_v54, %v375_v60 }
  0x87   :  { %v491_v4 = vmul.f32 %v1332_v54, %v376_v61  ;;  %v492_v5 = vmul.f32 %v1332_v54, %v377_v62  ;;  %v269_v6 = vsub.f32 %v72_v63, %v1319_v45  ;;  %v270_v7 = vsub.f32 %v72_v63, %v1321_v46 }
  0x88   :  { %v616_v9 = vmul.f32 1.442695, %v496_v0  ;;  %v618_v10 = vmul.f32 1.442695, %v497_v1  ;;  %v620_v11 = vmul.f32 1.442695, %v498_v2  ;;  %v271_v12 = vsub.f32 %v72_v63, %v1323_v47 }
  0x89   :  { %v604_v13 = vmul.f32 1.442695, %v490_v3  ;;  %v606_v14 = vmul.f32 1.442695, %v491_v4  ;;  %v608_v15 = vmul.f32 1.442695, %v492_v5  ;;  %v384_v16 = vmul.f32 %v269_v6, %v269_v6  ;;  %v82_v26 = vpop.permute.xlu1 %81  ;;  %v77_v36 = vpop.permute.xlu0 %76 }
  0x8a   :  { %953 = vpow2.f32 %v616_v9  ;;  %v385_v17 = vmul.f32 %v270_v7, %v270_v7  ;;  %v386_v18 = vmul.f32 %v271_v12, %v271_v12  ;;  %v263_v19 = vsub.f32 %v62_v8, %v1319_v45 }
  0x8b   :  { %955 = vpow2.f32 %v618_v10  ;;  %v499_v20 = vmul.f32 %v1332_v54, %v384_v16  ;;  %v264_v21 = vsub.f32 %v62_v8, %v1321_v46  ;;  %v265_v22 = vsub.f32 %v62_v8, %v1323_v47 }
  0x8c   :  { %957 = vpow2.f32 %v620_v11  ;;  %v500_v23 = vmul.f32 %v1332_v54, %v385_v17  ;;  %v501_v24 = vmul.f32 %v1332_v54, %v386_v18  ;;  %v378_v25 = vmul.f32 %v263_v19, %v263_v19 }
  0x8d   :  { %959 = vpow2.f32 %v604_v13  ;;  %v622_v27 = vmul.f32 1.442695, %v499_v20  ;;  %v379_v28 = vmul.f32 %v264_v21, %v264_v21  ;;  %v380_v29 = vmul.f32 %v265_v22, %v265_v22  ;;  %v92_v52 = vpop.permute.xlu1 %91  ;;  %v87_v7 = vpop.permute.xlu0 %86 }
  0x8e   :  { %961 = vpow2.f32 %v606_v14  ;;  %v624_v30 = vmul.f32 1.442695, %v500_v23  ;;  %v626_v31 = vmul.f32 1.442695, %v501_v24  ;;  %v493_v32 = vmul.f32 %v1332_v54, %v378_v25 }
  0x8f   :  { %963 = vpow2.f32 %v608_v15  ;;  %v494_v33 = vmul.f32 %v1332_v54, %v379_v28  ;;  %v495_v34 = vmul.f32 %v1332_v54, %v380_v29  ;;  %v275_v35 = vsub.f32 %v82_v26, %v1319_v45 }
  0x90   :  { %965 = vpow2.f32 %v622_v27  ;;  %v610_v37 = vmul.f32 1.442695, %v493_v32  ;;  %v276_v38 = vsub.f32 %v82_v26, %v1321_v46  ;;  %v277_v39 = vsub.f32 %v82_v26, %v1323_v47 }
  0x91   :  { %967 = vpow2.f32 %v624_v30  ;;  %v612_v40 = vmul.f32 1.442695, %v494_v33  ;;  %v614_v41 = vmul.f32 1.442695, %v495_v34  ;;  %v390_v42 = vmul.f32 %v275_v35, %v275_v35  ;;  %v102_v20 = vpop.permute.xlu1 %101 }
  0x92   :  { %969 = vpow2.f32 %v626_v31  ;;  %v391_v43 = vmul.f32 %v276_v38, %v276_v38  ;;  %v392_v44 = vmul.f32 %v277_v39, %v277_v39  ;;  %v272_v48 = vsub.f32 %v77_v36, %v1319_v45  ;;  %v97_v38 = vpop.permute.xlu0 %96 }
  0x93   :  { %971 = vpow2.f32 %v610_v37  ;;  %v505_v49 = vmul.f32 %v1332_v54, %v390_v42  ;;  %v273_v50 = vsub.f32 %v77_v36, %v1321_v46  ;;  %v274_v51 = vsub.f32 %v77_v36, %v1323_v47 }
  0x94   :  { %v954_v53 = vpop.eup %953  ;;  %973 = vpow2.f32 %v612_v40  ;;  %v506_v55 = vmul.f32 %v1332_v54, %v391_v43  ;;  %v507_v56 = vmul.f32 %v1332_v54, %v392_v44  ;;  %v387_v57 = vmul.f32 %v272_v48, %v272_v48 }
  0x95   :  { %v956_v58 = vpop.eup %955  ;;  %838 = vst [vmem:[%s1903_s3 + $0x30] sm:$0xff] %v954_v53  ;;  %975 = vpow2.f32 %v614_v41  ;;  %v634_v59 = vmul.f32 1.442695, %v505_v49  ;;  %v388_v60 = vmul.f32 %v273_v50, %v273_v50  ;;  %v389_v61 = vmul.f32 %v274_v51, %v274_v51 }
  0x96   :  { %v958_v62 = vpop.eup %957  ;;  %839 = vst [vmem:[%s1903_s3 + $0x38] sm:$0xff] %v956_v58  ;;  %v636_v63 = vmul.f32 1.442695, %v506_v55  ;;  %v638_v0 = vmul.f32 1.442695, %v507_v56  ;;  %v502_v1 = vmul.f32 %v1332_v54, %v387_v57  ;;  %v281_v2 = vsub.f32 %v92_v52, %v1319_v45 }
  0x97   :  { %v960_v3 = vpop.eup %959  ;;  %840 = vst [vmem:[%s1903_s3 + $0x40] sm:$0xff] %v958_v62  ;;  %977 = vpow2.f32 %v634_v59  ;;  %v503_v4 = vmul.f32 %v1332_v54, %v388_v60  ;;  %v504_v5 = vmul.f32 %v1332_v54, %v389_v61  ;;  %v282_v6 = vsub.f32 %v92_v52, %v1321_v46  ;;  %v112_v59 = vpop.permute.xlu1 %111 }
  0x98   :  { %v962_v8 = vpop.eup %961  ;;  %832 = vst [vmem:[%s1903_s3] sm:$0xff] %v960_v3  ;;  %979 = vpow2.f32 %v636_v63  ;;  %v628_v9 = vmul.f32 1.442695, %v502_v1  ;;  %v283_v10 = vsub.f32 %v92_v52, %v1323_v47  ;;  %v396_v11 = vmul.f32 %v281_v2, %v281_v2 }
  0x99   :  { %v964_v12 = vpop.eup %963  ;;  %833 = vst [vmem:[%s1903_s3 + $0x8] sm:$0xff] %v962_v8  ;;  %981 = vpow2.f32 %v638_v0  ;;  %v630_v13 = vmul.f32 1.442695, %v503_v4  ;;  %v632_v14 = vmul.f32 1.442695, %v504_v5  ;;  %v397_v15 = vmul.f32 %v282_v6, %v282_v6 }
  0x9a   :  { %v966_v16 = vpop.eup %965  ;;  %834 = vst [vmem:[%s1903_s3 + $0x10] sm:$0xff] %v964_v12  ;;  %983 = vpow2.f32 %v628_v9  ;;  %v398_v17 = vmul.f32 %v283_v10, %v283_v10  ;;  %v511_v18 = vmul.f32 %v1332_v54, %v396_v11  ;;  %v278_v19 = vsub.f32 %v87_v7, %v1319_v45 }
  0x9b   :  { %v968_v21 = vpop.eup %967  ;;  %841 = vst [vmem:[%s1903_s3 + $0x48] sm:$0xff] %v966_v16  ;;  %985 = vpow2.f32 %v630_v13  ;;  %v512_v22 = vmul.f32 %v1332_v54, %v397_v15  ;;  %v279_v23 = vsub.f32 %v87_v7, %v1321_v46  ;;  %v280_v24 = vsub.f32 %v87_v7, %v1323_v47  ;;  %v107_v13 = vpop.permute.xlu0 %106 }
  0x9c   :  { %v970_v25 = vpop.eup %969  ;;  %842 = vst [vmem:[%s1903_s3 + $0x50] sm:$0xff] %v968_v21  ;;  %987 = vpow2.f32 %v632_v14  ;;  %v513_v26 = vmul.f32 %v1332_v54, %v398_v17  ;;  %v646_v27 = vmul.f32 1.442695, %v511_v18  ;;  %v393_v28 = vmul.f32 %v278_v19, %v278_v19 }
  0x9d   :  { %v972_v29 = vpop.eup %971  ;;  %843 = vst [vmem:[%s1903_s3 + $0x58] sm:$0xff] %v970_v25  ;;  %v648_v30 = vmul.f32 1.442695, %v512_v22  ;;  %v394_v31 = vmul.f32 %v279_v23, %v279_v23  ;;  %v395_v32 = vmul.f32 %v280_v24, %v280_v24  ;;  %v287_v33 = vsub.f32 %v102_v20, %v1319_v45  ;;  %v122_v25 = vpop.permute.xlu1 %121 }
  0x9e   :  { %v974_v34 = vpop.eup %973  ;;  %835 = vst [vmem:[%s1903_s3 + $0x18] sm:$0xff] %v972_v29  ;;  %989 = vpow2.f32 %v646_v27  ;;  %v650_v35 = vmul.f32 1.442695, %v513_v26  ;;  %v508_v36 = vmul.f32 %v1332_v54, %v393_v28  ;;  %v288_v37 = vsub.f32 %v102_v20, %v1321_v46 }
  0x9f   :  { %v976_v39 = vpop.eup %975  ;;  %836 = vst [vmem:[%s1903_s3 + $0x20] sm:$0xff] %v974_v34  ;;  %991 = vpow2.f32 %v648_v30  ;;  %v509_v40 = vmul.f32 %v1332_v54, %v394_v31  ;;  %v510_v41 = vmul.f32 %v1332_v54, %v395_v32  ;;  %v289_v42 = vsub.f32 %v102_v20, %v1323_v47 }
  0xa0   :  { %837 = vst [vmem:[%s1903_s3 + $0x28] sm:$0xff] %v976_v39  ;;  %993 = vpow2.f32 %v650_v35  ;;  %v640_v43 = vmul.f32 1.442695, %v508_v36  ;;  %v402_v44 = vmul.f32 %v287_v33, %v287_v33  ;;  %v403_v48 = vmul.f32 %v288_v37, %v288_v37 }
  0xa1   :  { %v978_v49 = vpop.eup %977  ;;  %v642_v50 = vmul.f32 1.442695, %v509_v40  ;;  %v644_v51 = vmul.f32 1.442695, %v510_v41  ;;  %v404_v52 = vmul.f32 %v289_v42, %v289_v42  ;;  %v284_v53 = vsub.f32 %v97_v38, %v1319_v45  ;;  %v117_v42 = vpop.permute.xlu0 %116 }
  0xa2   :  { %v980_v55 = vpop.eup %979  ;;  %847 = vst [vmem:[%s1903_s3 + $0x78] sm:$0xff] %v978_v49  ;;  %995 = vpow2.f32 %v640_v43  ;;  %v517_v56 = vmul.f32 %v1332_v54, %v402_v44  ;;  %v518_v57 = vmul.f32 %v1332_v54, %v403_v48  ;;  %v285_v58 = vsub.f32 %v97_v38, %v1321_v46 }
  0xa3   :  { %v982_v60 = vpop.eup %981  ;;  %848 = vst [vmem:[%s1903_s3 + $0x80] sm:$0xff] %v980_v55  ;;  %997 = vpow2.f32 %v642_v50  ;;  %v519_v61 = vmul.f32 %v1332_v54, %v404_v52  ;;  %v286_v62 = vsub.f32 %v97_v38, %v1323_v47  ;;  %v399_v63 = vmul.f32 %v284_v53, %v284_v53 }
  0xa4   :  { %v984_v0 = vpop.eup %983  ;;  %849 = vst [vmem:[%s1903_s3 + $0x88] sm:$0xff] %v982_v60  ;;  %999 = vpow2.f32 %v644_v51  ;;  %v658_v1 = vmul.f32 1.442695, %v517_v56  ;;  %v660_v2 = vmul.f32 1.442695, %v518_v57  ;;  %v400_v3 = vmul.f32 %v285_v58, %v285_v58 }
  0xa5   :  { %v986_v4 = vpop.eup %985  ;;  %844 = vst [vmem:[%s1903_s3 + $0x60] sm:$0xff] %v984_v0  ;;  %v662_v5 = vmul.f32 1.442695, %v519_v61  ;;  %v401_v6 = vmul.f32 %v286_v62, %v286_v62  ;;  %v514_v7 = vmul.f32 %v1332_v54, %v399_v63  ;;  %v293_v8 = vsub.f32 %v112_v59, %v1319_v45  ;;  %v132_v63 = vpop.permute.xlu1 %131 }
  0xa6   :  { %v988_v9 = vpop.eup %987  ;;  %845 = vst [vmem:[%s1903_s3 + $0x68] sm:$0xff] %v986_v4  ;;  %1001 = vpow2.f32 %v658_v1  ;;  %v515_v10 = vmul.f32 %v1332_v54, %v400_v3  ;;  %v294_v11 = vsub.f32 %v112_v59, %v1321_v46  ;;  %v295_v12 = vsub.f32 %v112_v59, %v1323_v47 }
  0xa7   :  { %846 = vst [vmem:[%s1903_s3 + $0x70] sm:$0xff] %v988_v9  ;;  %1003 = vpow2.f32 %v660_v2  ;;  %v516_v14 = vmul.f32 %v1332_v54, %v401_v6  ;;  %v652_v15 = vmul.f32 1.442695, %v514_v7  ;;  %v408_v16 = vmul.f32 %v293_v8, %v293_v8 }
  0xa8   :  { %v990_v17 = vpop.eup %989  ;;  %1005 = vpow2.f32 %v662_v5  ;;  %v654_v18 = vmul.f32 1.442695, %v515_v10  ;;  %v409_v19 = vmul.f32 %v294_v11, %v294_v11  ;;  %v410_v20 = vmul.f32 %v295_v12, %v295_v12  ;;  %v127_v12 = vpop.permute.xlu0 %126 }
  0xa9   :  { %v992_v21 = vpop.eup %991  ;;  %853 = vst [vmem:[%s1903_s3 + $0xa8] sm:$0xff] %v990_v17  ;;  %1007 = vpow2.f32 %v652_v15  ;;  %v656_v22 = vmul.f32 1.442695, %v516_v14  ;;  %v523_v23 = vmul.f32 %v1332_v54, %v408_v16  ;;  %v290_v24 = vsub.f32 %v107_v13, %v1319_v45 }
  0xaa   :  { %v994_v26 = vpop.eup %993  ;;  %854 = vst [vmem:[%s1903_s3 + $0xb0] sm:$0xff] %v992_v21  ;;  %1009 = vpow2.f32 %v654_v18  ;;  %v524_v27 = vmul.f32 %v1332_v54, %v409_v19  ;;  %v525_v28 = vmul.f32 %v1332_v54, %v410_v20  ;;  %v291_v29 = vsub.f32 %v107_v13, %v1321_v46 }
  0xab   :  { %855 = vst [vmem:[%s1903_s3 + $0xb8] sm:$0xff] %v994_v26  ;;  %1011 = vpow2.f32 %v656_v22  ;;  %v670_v30 = vmul.f32 1.442695, %v523_v23  ;;  %v292_v31 = vsub.f32 %v107_v13, %v1323_v47  ;;  %v405_v32 = vmul.f32 %v290_v24, %v290_v24 }
  0xac   :  { %v996_v33 = vpop.eup %995  ;;  %v672_v34 = vmul.f32 1.442695, %v524_v27  ;;  %v674_v35 = vmul.f32 1.442695, %v525_v28  ;;  %v406_v36 = vmul.f32 %v291_v29, %v291_v29  ;;  %v299_v37 = vsub.f32 %v122_v25, %v1319_v45 }
  0xad   :  { %v998_v38 = vpop.eup %997  ;;  %850 = vst [vmem:[%s1903_s3 + $0x90] sm:$0xff] %v996_v33  ;;  %1013 = vpow2.f32 %v670_v30  ;;  %v407_v39 = vmul.f32 %v292_v31, %v292_v31  ;;  %v520_v40 = vmul.f32 %v1332_v54, %v405_v32  ;;  %v300_v41 = vsub.f32 %v122_v25, %v1321_v46 }
  0xae   :  { %v1000_v43 = vpop.eup %999  ;;  %851 = vst [vmem:[%s1903_s3 + $0x98] sm:$0xff] %v998_v38  ;;  %1015 = vpow2.f32 %v672_v34  ;;  %v521_v44 = vmul.f32 %v1332_v54, %v406_v36  ;;  %v301_v48 = vsub.f32 %v122_v25, %v1323_v47  ;;  %v414_v49 = vmul.f32 %v299_v37, %v299_v37  ;;  %v142_v34 = vpop.permute.xlu1 %141 }
  0xaf   :  { %852 = vst [vmem:[%s1903_s3 + $0xa0] sm:$0xff] %v1000_v43  ;;  %1017 = vpow2.f32 %v674_v35  ;;  %v522_v50 = vmul.f32 %v1332_v54, %v407_v39  ;;  %v664_v51 = vmul.f32 1.442695, %v520_v40  ;;  %v415_v52 = vmul.f32 %v300_v41, %v300_v41 }
  0xb0   :  { %v1002_v53 = vpop.eup %1001  ;;  %v666_v55 = vmul.f32 1.442695, %v521_v44  ;;  %v416_v56 = vmul.f32 %v301_v48, %v301_v48  ;;  %v529_v57 = vmul.f32 %v1332_v54, %v414_v49  ;;  %v296_v58 = vsub.f32 %v117_v42, %v1319_v45  ;;  %v137_v49 = vpop.permute.xlu0 %136 }
  0xb1   :  { %v1004_v59 = vpop.eup %1003  ;;  %859 = vst [vmem:[%s1903_s3 + $0xd8] sm:$0xff] %v1002_v53  ;;  %1019 = vpow2.f32 %v664_v51  ;;  %v668_v60 = vmul.f32 1.442695, %v522_v50  ;;  %v530_v61 = vmul.f32 %v1332_v54, %v415_v52  ;;  %v297_v62 = vsub.f32 %v117_v42, %v1321_v46 }
  0xb2   :  { %v1006_v0 = vpop.eup %1005  ;;  %860 = vst [vmem:[%s1903_s3 + $0xe0] sm:$0xff] %v1004_v59  ;;  %1021 = vpow2.f32 %v666_v55  ;;  %v531_v1 = vmul.f32 %v1332_v54, %v416_v56  ;;  %v682_v2 = vmul.f32 1.442695, %v529_v57  ;;  %v298_v3 = vsub.f32 %v117_v42, %v1323_v47 }
  0xb3   :  { %v1008_v4 = vpop.eup %1007  ;;  %861 = vst [vmem:[%s1903_s3 + $0xe8] sm:$0xff] %v1006_v0  ;;  %1023 = vpow2.f32 %v668_v60  ;;  %v684_v5 = vmul.f32 1.442695, %v530_v61  ;;  %v411_v6 = vmul.f32 %v296_v58, %v296_v58  ;;  %v412_v7 = vmul.f32 %v297_v62, %v297_v62 }
  0xb4   :  { %v1010_v8 = vpop.eup %1009  ;;  %856 = vst [vmem:[%s1903_s3 + $0xc0] sm:$0xff] %v1008_v4  ;;  %1025 = vpow2.f32 %v682_v2  ;;  %v686_v9 = vmul.f32 1.442695, %v531_v1  ;;  %v413_v10 = vmul.f32 %v298_v3, %v298_v3  ;;  %v305_v11 = vsub.f32 %v132_v63, %v1319_v45 }
  0xb5   :  { %v1012_v13 = vpop.eup %1011  ;;  %857 = vst [vmem:[%s1903_s3 + $0xc8] sm:$0xff] %v1010_v8  ;;  %1027 = vpow2.f32 %v684_v5  ;;  %v526_v14 = vmul.f32 %v1332_v54, %v411_v6  ;;  %v527_v15 = vmul.f32 %v1332_v54, %v412_v7  ;;  %v306_v16 = vsub.f32 %v132_v63, %v1321_v46 }
  0xb6   :  { %858 = vst [vmem:[%s1903_s3 + $0xd0] sm:$0xff] %v1012_v13  ;;  %1029 = vpow2.f32 %v686_v9  ;;  %v528_v17 = vmul.f32 %v1332_v54, %v413_v10  ;;  %v307_v18 = vsub.f32 %v132_v63, %v1323_v47  ;;  %v420_v19 = vmul.f32 %v305_v11, %v305_v11  ;;  %v152_v63 = vpop.permute.xlu1 %151 }
  0xb7   :  { %v1014_v20 = vpop.eup %1013  ;;  %v676_v21 = vmul.f32 1.442695, %v526_v14  ;;  %v678_v22 = vmul.f32 1.442695, %v527_v15  ;;  %v421_v23 = vmul.f32 %v306_v16, %v306_v16  ;;  %v302_v24 = vsub.f32 %v127_v12, %v1319_v45 }
  0xb8   :  { %v1016_v25 = vpop.eup %1015  ;;  %865 = vst [vmem:[%s1903_s3 + $0x108] sm:$0xff] %v1014_v20  ;;  %v680_v26 = vmul.f32 1.442695, %v528_v17  ;;  %v422_v27 = vmul.f32 %v307_v18, %v307_v18  ;;  %v535_v28 = vmul.f32 %v1332_v54, %v420_v19  ;;  %v303_v29 = vsub.f32 %v127_v12, %v1321_v46  ;;  %v147_v20 = vpop.permute.xlu0 %146 }
  0xb9   :  { %v1018_v30 = vpop.eup %1017  ;;  %866 = vst [vmem:[%s1903_s3 + $0x110] sm:$0xff] %v1016_v25  ;;  %1031 = vpow2.f32 %v676_v21  ;;  %v536_v31 = vmul.f32 %v1332_v54, %v421_v23  ;;  %v304_v32 = vsub.f32 %v127_v12, %v1323_v47  ;;  %v417_v33 = vmul.f32 %v302_v24, %v302_v24 }
  0xba   :  { %867 = vst [vmem:[%s1903_s3 + $0x118] sm:$0xff] %v1018_v30  ;;  %1033 = vpow2.f32 %v678_v22  ;;  %v537_v35 = vmul.f32 %v1332_v54, %v422_v27  ;;  %v694_v36 = vmul.f32 1.442695, %v535_v28  ;;  %v418_v37 = vmul.f32 %v303_v29, %v303_v29 }
  0xbb   :  { %v1020_v38 = vpop.eup %1019  ;;  %1035 = vpow2.f32 %v680_v26  ;;  %v696_v39 = vmul.f32 1.442695, %v536_v31  ;;  %v419_v40 = vmul.f32 %v304_v32, %v304_v32  ;;  %v532_v41 = vmul.f32 %v1332_v54, %v417_v33  ;;  %v162_v33 = vpop.permute.xlu1 %161 }
  0xbc   :  { %v1022_v42 = vpop.eup %1021  ;;  %862 = vst [vmem:[%s1903_s3 + $0xf0] sm:$0xff] %v1020_v38  ;;  %1037 = vpow2.f32 %v694_v36  ;;  %v698_v43 = vmul.f32 1.442695, %v537_v35  ;;  %v533_v44 = vmul.f32 %v1332_v54, %v418_v37  ;;  %v311_v48 = vsub.f32 %v142_v34, %v1319_v45 }
  0xbd   :  { %v1024_v50 = vpop.eup %1023  ;;  %863 = vst [vmem:[%s1903_s3 + $0xf8] sm:$0xff] %v1022_v42  ;;  %1039 = vpow2.f32 %v696_v39  ;;  %v534_v51 = vmul.f32 %v1332_v54, %v419_v40  ;;  %v688_v52 = vmul.f32 1.442695, %v532_v41  ;;  %v312_v53 = vsub.f32 %v142_v34, %v1321_v46 }
  0xbe   :  { %v1026_v55 = vpop.eup %1025  ;;  %864 = vst [vmem:[%s1903_s3 + $0x100] sm:$0xff] %v1024_v50  ;;  %1041 = vpow2.f32 %v698_v43  ;;  %v690_v56 = vmul.f32 1.442695, %v533_v44  ;;  %v313_v57 = vsub.f32 %v142_v34, %v1323_v47  ;;  %v426_v58 = vmul.f32 %v311_v48, %v311_v48 }
  0xbf   :  { %v1028_v59 = vpop.eup %1027  ;;  %871 = vst [vmem:[%s1903_s3 + $0x138] sm:$0xff] %v1026_v55  ;;  %1043 = vpow2.f32 %v688_v52  ;;  %v692_v60 = vmul.f32 1.442695, %v534_v51  ;;  %v427_v61 = vmul.f32 %v312_v53, %v312_v53  ;;  %v308_v62 = vsub.f32 %v137_v49, %v1319_v45  ;;  %v157_v55 = vpop.permute.xlu0 %156 }
  0xc0   :  { %v1030_v0 = vpop.eup %1029  ;;  %872 = vst [vmem:[%s1903_s3 + $0x140] sm:$0xff] %v1028_v59  ;;  %1045 = vpow2.f32 %v690_v56  ;;  %v428_v1 = vmul.f32 %v313_v57, %v313_v57  ;;  %v541_v2 = vmul.f32 %v1332_v54, %v426_v58  ;;  %v309_v3 = vsub.f32 %v137_v49, %v1321_v46 }
  0xc1   :  { %873 = vst [vmem:[%s1903_s3 + $0x148] sm:$0xff] %v1030_v0  ;;  %1047 = vpow2.f32 %v692_v60  ;;  %v542_v4 = vmul.f32 %v1332_v54, %v427_v61  ;;  %v310_v5 = vsub.f32 %v137_v49, %v1323_v47  ;;  %v423_v6 = vmul.f32 %v308_v62, %v308_v62 }
  0xc2   :  { %v543_v7 = vmul.f32 %v1332_v54, %v428_v1  ;;  %v706_v8 = vmul.f32 1.442695, %v541_v2  ;;  %v424_v9 = vmul.f32 %v309_v3, %v309_v3  ;;  %v317_v10 = vsub.f32 %v152_v63, %v1319_v45 }
  0xc3   :  { %v1032_v11 = vpop.eup %1031  ;;  %v708_v12 = vmul.f32 1.442695, %v542_v4  ;;  %v425_v13 = vmul.f32 %v310_v5, %v310_v5  ;;  %v538_v14 = vmul.f32 %v1332_v54, %v423_v6  ;;  %v318_v15 = vsub.f32 %v152_v63, %v1321_v46 }
  0xc4   :  { %v1034_v16 = vpop.eup %1033  ;;  %868 = vst [vmem:[%s1903_s3 + $0x120] sm:$0xff] %v1032_v11  ;;  %1049 = vpow2.f32 %v706_v8  ;;  %v710_v17 = vmul.f32 1.442695, %v543_v7  ;;  %v539_v18 = vmul.f32 %v1332_v54, %v424_v9  ;;  %v319_v19 = vsub.f32 %v152_v63, %v1323_v47  ;;  %v172_v7 = vpop.permute.xlu1 %171 }
  0xc5   :  { %v1036_v21 = vpop.eup %1035  ;;  %869 = vst [vmem:[%s1903_s3 + $0x128] sm:$0xff] %v1034_v16  ;;  %1051 = vpow2.f32 %v708_v12  ;;  %v540_v22 = vmul.f32 %v1332_v54, %v425_v13  ;;  %v700_v23 = vmul.f32 1.442695, %v538_v14  ;;  %v432_v24 = vmul.f32 %v317_v10, %v317_v10 }
  0xc6   :  { %v1038_v25 = vpop.eup %1037  ;;  %870 = vst [vmem:[%s1903_s3 + $0x130] sm:$0xff] %v1036_v21  ;;  %1053 = vpow2.f32 %v710_v17  ;;  %v702_v26 = vmul.f32 1.442695, %v539_v18  ;;  %v433_v27 = vmul.f32 %v318_v15, %v318_v15  ;;  %v434_v28 = vmul.f32 %v319_v19, %v319_v19 }
  0xc7   :  { %v1040_v29 = vpop.eup %1039  ;;  %877 = vst [vmem:[%s1903_s3 + $0x168] sm:$0xff] %v1038_v25  ;;  %1055 = vpow2.f32 %v700_v23  ;;  %v704_v30 = vmul.f32 1.442695, %v540_v22  ;;  %v547_v31 = vmul.f32 %v1332_v54, %v432_v24  ;;  %v314_v32 = vsub.f32 %v147_v20, %v1319_v45 }
  0xc8   :  { %v1042_v34 = vpop.eup %1041  ;;  %878 = vst [vmem:[%s1903_s3 + $0x170] sm:$0xff] %v1040_v29  ;;  %1057 = vpow2.f32 %v702_v26  ;;  %v548_v35 = vmul.f32 %v1332_v54, %v433_v27  ;;  %v549_v36 = vmul.f32 %v1332_v54, %v434_v28  ;;  %v315_v37 = vsub.f32 %v147_v20, %v1321_v46 }
  0xc9   :  { %v1044_v38 = vpop.eup %1043  ;;  %879 = vst [vmem:[%s1903_s3 + $0x178] sm:$0xff] %v1042_v34  ;;  %1059 = vpow2.f32 %v704_v30  ;;  %v718_v39 = vmul.f32 1.442695, %v547_v31  ;;  %v316_v40 = vsub.f32 %v147_v20, %v1323_v47  ;;  %v429_v41 = vmul.f32 %v314_v32, %v314_v32  ;;  %v167_v20 = vpop.permute.xlu0 %166 }
  0xca   :  { %v1046_v42 = vpop.eup %1045  ;;  %874 = vst [vmem:[%s1903_s3 + $0x150] sm:$0xff] %v1044_v38  ;;  %v720_v43 = vmul.f32 1.442695, %v548_v35  ;;  %v722_v44 = vmul.f32 1.442695, %v549_v36  ;;  %v430_v48 = vmul.f32 %v315_v37, %v315_v37  ;;  %v323_v49 = vsub.f32 %v162_v33, %v1319_v45 }
  0xcb   :  { %v1048_v50 = vpop.eup %1047  ;;  %875 = vst [vmem:[%s1903_s3 + $0x158] sm:$0xff] %v1046_v42  ;;  %1061 = vpow2.f32 %v718_v39  ;;  %v431_v51 = vmul.f32 %v316_v40, %v316_v40  ;;  %v544_v52 = vmul.f32 %v1332_v54, %v429_v41  ;;  %v324_v53 = vsub.f32 %v162_v33, %v1321_v46  ;;  %v182_v42 = vpop.permute.xlu1 %181 }
  0xcc   :  { %876 = vst [vmem:[%s1903_s3 + $0x160] sm:$0xff] %v1048_v50  ;;  %1063 = vpow2.f32 %v720_v43  ;;  %v545_v56 = vmul.f32 %v1332_v54, %v430_v48  ;;  %v325_v57 = vsub.f32 %v162_v33, %v1323_v47  ;;  %v438_v58 = vmul.f32 %v323_v49, %v323_v49 }
  0xcd   :  { %1065 = vpow2.f32 %v722_v44  ;;  %v546_v59 = vmul.f32 %v1332_v54, %v431_v51  ;;  %v712_v60 = vmul.f32 1.442695, %v544_v52  ;;  %v439_v61 = vmul.f32 %v324_v53, %v324_v53 }
  0xce   :  { %v1050_v62 = vpop.eup %1049  ;;  %v714_v63 = vmul.f32 1.442695, %v545_v56  ;;  %v440_v0 = vmul.f32 %v325_v57, %v325_v57  ;;  %v553_v1 = vmul.f32 %v1332_v54, %v438_v58  ;;  %v320_v2 = vsub.f32 %v157_v55, %v1319_v45  ;;  %v177_v58 = vpop.permute.xlu0 %176 }
  0xcf   :  { %v1052_v3 = vpop.eup %1051  ;;  %883 = vst [vmem:[%s1903_s3 + $0x198] sm:$0xff] %v1050_v62  ;;  %1067 = vpow2.f32 %v712_v60  ;;  %v716_v4 = vmul.f32 1.442695, %v546_v59  ;;  %v554_v5 = vmul.f32 %v1332_v54, %v439_v61  ;;  %v321_v6 = vsub.f32 %v157_v55, %v1321_v46 }
  0xd0   :  { %v1054_v8 = vpop.eup %1053  ;;  %884 = vst [vmem:[%s1903_s3 + $0x1a0] sm:$0xff] %v1052_v3  ;;  %1069 = vpow2.f32 %v714_v63  ;;  %v555_v9 = vmul.f32 %v1332_v54, %v440_v0  ;;  %v730_v10 = vmul.f32 1.442695, %v553_v1  ;;  %v322_v11 = vsub.f32 %v157_v55, %v1323_v47 }
  0xd1   :  { %v1056_v12 = vpop.eup %1055  ;;  %885 = vst [vmem:[%s1903_s3 + $0x1a8] sm:$0xff] %v1054_v8  ;;  %1071 = vpow2.f32 %v716_v4  ;;  %v732_v13 = vmul.f32 1.442695, %v554_v5  ;;  %v435_v14 = vmul.f32 %v320_v2, %v320_v2  ;;  %v436_v15 = vmul.f32 %v321_v6, %v321_v6 }
  0xd2   :  { %v1058_v16 = vpop.eup %1057  ;;  %880 = vst [vmem:[%s1903_s3 + $0x180] sm:$0xff] %v1056_v12  ;;  %1073 = vpow2.f32 %v730_v10  ;;  %v734_v17 = vmul.f32 1.442695, %v555_v9  ;;  %v437_v18 = vmul.f32 %v322_v11, %v322_v11  ;;  %v329_v19 = vsub.f32 %v172_v7, %v1319_v45 }
  0xd3   :  { %v1060_v21 = vpop.eup %1059  ;;  %881 = vst [vmem:[%s1903_s3 + $0x188] sm:$0xff] %v1058_v16  ;;  %1075 = vpow2.f32 %v732_v13  ;;  %v550_v22 = vmul.f32 %v1332_v54, %v435_v14  ;;  %v551_v23 = vmul.f32 %v1332_v54, %v436_v15  ;;  %v330_v24 = vsub.f32 %v172_v7, %v1321_v46 }
  0xd4   :  { %882 = vst [vmem:[%s1903_s3 + $0x190] sm:$0xff] %v1060_v21  ;;  %1077 = vpow2.f32 %v734_v17  ;;  %v552_v25 = vmul.f32 %v1332_v54, %v437_v18  ;;  %v331_v26 = vsub.f32 %v172_v7, %v1323_v47  ;;  %v444_v27 = vmul.f32 %v329_v19, %v329_v19  ;;  %v192_v7 = vpop.permute.xlu1 %191 }
  0xd5   :  { %v1062_v28 = vpop.eup %1061  ;;  %v724_v29 = vmul.f32 1.442695, %v550_v22  ;;  %v726_v30 = vmul.f32 1.442695, %v551_v23  ;;  %v445_v31 = vmul.f32 %v330_v24, %v330_v24  ;;  %v326_v32 = vsub.f32 %v167_v20, %v1319_v45 }
  0xd6   :  { %v1064_v33 = vpop.eup %1063  ;;  %889 = vst [vmem:[%s1903_s3 + $0x1c8] sm:$0xff] %v1062_v28  ;;  %v728_v34 = vmul.f32 1.442695, %v552_v25  ;;  %v446_v35 = vmul.f32 %v331_v26, %v331_v26  ;;  %v559_v36 = vmul.f32 %v1332_v54, %v444_v27  ;;  %v327_v37 = vsub.f32 %v167_v20, %v1321_v46  ;;  %v187_v28 = vpop.permute.xlu0 %186 }
  0xd7   :  { %v1066_v38 = vpop.eup %1065  ;;  %890 = vst [vmem:[%s1903_s3 + $0x1d0] sm:$0xff] %v1064_v33  ;;  %1079 = vpow2.f32 %v724_v29  ;;  %v560_v39 = vmul.f32 %v1332_v54, %v445_v31  ;;  %v328_v40 = vsub.f32 %v167_v20, %v1323_v47  ;;  %v441_v41 = vmul.f32 %v326_v32, %v326_v32 }
  0xd8   :  { %891 = vst [vmem:[%s1903_s3 + $0x1d8] sm:$0xff] %v1066_v38  ;;  %1081 = vpow2.f32 %v726_v30  ;;  %v561_v43 = vmul.f32 %v1332_v54, %v446_v35  ;;  %v742_v44 = vmul.f32 1.442695, %v559_v36  ;;  %v442_v48 = vmul.f32 %v327_v37, %v327_v37 }
  0xd9   :  { %v1068_v49 = vpop.eup %1067  ;;  %1083 = vpow2.f32 %v728_v34  ;;  %v744_v50 = vmul.f32 1.442695, %v560_v39  ;;  %v443_v51 = vmul.f32 %v328_v40, %v328_v40  ;;  %v556_v52 = vmul.f32 %v1332_v54, %v441_v41  ;;  %v202_v41 = vpop.permute.xlu1 %201 }
  0xda   :  { %v1070_v53 = vpop.eup %1069  ;;  %886 = vst [vmem:[%s1903_s3 + $0x1b0] sm:$0xff] %v1068_v49  ;;  %1085 = vpow2.f32 %v742_v44  ;;  %v746_v55 = vmul.f32 1.442695, %v561_v43  ;;  %v557_v56 = vmul.f32 %v1332_v54, %v442_v48  ;;  %v335_v57 = vsub.f32 %v182_v42, %v1319_v45 }
  0xdb   :  { %v1072_v59 = vpop.eup %1071  ;;  %887 = vst [vmem:[%s1903_s3 + $0x1b8] sm:$0xff] %v1070_v53  ;;  %1087 = vpow2.f32 %v744_v50  ;;  %v558_v60 = vmul.f32 %v1332_v54, %v443_v51  ;;  %v736_v61 = vmul.f32 1.442695, %v556_v52  ;;  %v336_v62 = vsub.f32 %v182_v42, %v1321_v46 }
  0xdc   :  { %v1074_v63 = vpop.eup %1073  ;;  %888 = vst [vmem:[%s1903_s3 + $0x1c0] sm:$0xff] %v1072_v59  ;;  %1089 = vpow2.f32 %v746_v55  ;;  %v738_v0 = vmul.f32 1.442695, %v557_v56  ;;  %v337_v1 = vsub.f32 %v182_v42, %v1323_v47  ;;  %v450_v2 = vmul.f32 %v335_v57, %v335_v57 }
  0xdd   :  { %v1076_v3 = vpop.eup %1075  ;;  %895 = vst [vmem:[%s1903_s3 + $0x1f8] sm:$0xff] %v1074_v63  ;;  %1091 = vpow2.f32 %v736_v61  ;;  %v740_v4 = vmul.f32 1.442695, %v558_v60  ;;  %v451_v5 = vmul.f32 %v336_v62, %v336_v62  ;;  %v332_v6 = vsub.f32 %v177_v58, %v1319_v45  ;;  %v197_v63 = vpop.permute.xlu0 %196 }
  0xde   :  { %v1078_v8 = vpop.eup %1077  ;;  %896 = vst [vmem:[%s1903_s3 + $0x200] sm:$0xff] %v1076_v3  ;;  %1093 = vpow2.f32 %v738_v0  ;;  %v452_v9 = vmul.f32 %v337_v1, %v337_v1  ;;  %v565_v10 = vmul.f32 %v1332_v54, %v450_v2  ;;  %v333_v11 = vsub.f32 %v177_v58, %v1321_v46 }
  0xdf   :  { %897 = vst [vmem:[%s1903_s3 + $0x208] sm:$0xff] %v1078_v8  ;;  %1095 = vpow2.f32 %v740_v4  ;;  %v566_v12 = vmul.f32 %v1332_v54, %v451_v5  ;;  %v334_v13 = vsub.f32 %v177_v58, %v1323_v47  ;;  %v447_v14 = vmul.f32 %v332_v6, %v332_v6 }
  0xe0   :  { %v567_v15 = vmul.f32 %v1332_v54, %v452_v9  ;;  %v754_v16 = vmul.f32 1.442695, %v565_v10  ;;  %v448_v17 = vmul.f32 %v333_v11, %v333_v11  ;;  %v341_v18 = vsub.f32 %v192_v7, %v1319_v45 }
  0xe1   :  { %v1080_v19 = vpop.eup %1079  ;;  %v756_v20 = vmul.f32 1.442695, %v566_v12  ;;  %v449_v21 = vmul.f32 %v334_v13, %v334_v13  ;;  %v562_v22 = vmul.f32 %v1332_v54, %v447_v14  ;;  %v342_v23 = vsub.f32 %v192_v7, %v1321_v46 }
  0xe2   :  { %v1082_v24 = vpop.eup %1081  ;;  %892 = vst [vmem:[%s1903_s3 + $0x1e0] sm:$0xff] %v1080_v19  ;;  %1097 = vpow2.f32 %v754_v16  ;;  %v758_v25 = vmul.f32 1.442695, %v567_v15  ;;  %v563_v26 = vmul.f32 %v1332_v54, %v448_v17  ;;  %v343_v27 = vsub.f32 %v192_v7, %v1323_v47  ;;  %v212_v15 = vpop.permute.xlu1 %211 }
  0xe3   :  { %v1084_v29 = vpop.eup %1083  ;;  %893 = vst [vmem:[%s1903_s3 + $0x1e8] sm:$0xff] %v1082_v24  ;;  %1099 = vpow2.f32 %v756_v20  ;;  %v564_v30 = vmul.f32 %v1332_v54, %v449_v21  ;;  %v748_v31 = vmul.f32 1.442695, %v562_v22  ;;  %v456_v32 = vmul.f32 %v341_v18, %v341_v18 }
  0xe4   :  { %v1086_v33 = vpop.eup %1085  ;;  %894 = vst [vmem:[%s1903_s3 + $0x1f0] sm:$0xff] %v1084_v29  ;;  %1101 = vpow2.f32 %v758_v25  ;;  %v750_v34 = vmul.f32 1.442695, %v563_v26  ;;  %v457_v35 = vmul.f32 %v342_v23, %v342_v23  ;;  %v458_v36 = vmul.f32 %v343_v27, %v343_v27 }
  0xe5   :  { %v1088_v37 = vpop.eup %1087  ;;  %901 = vst [vmem:[%s1903_s3 + $0x228] sm:$0xff] %v1086_v33  ;;  %1103 = vpow2.f32 %v748_v31  ;;  %v752_v38 = vmul.f32 1.442695, %v564_v30  ;;  %v571_v39 = vmul.f32 %v1332_v54, %v456_v32  ;;  %v338_v40 = vsub.f32 %v187_v28, %v1319_v45 }
  0xe6   :  { %v1090_v42 = vpop.eup %1089  ;;  %902 = vst [vmem:[%s1903_s3 + $0x230] sm:$0xff] %v1088_v37  ;;  %1105 = vpow2.f32 %v750_v34  ;;  %v572_v43 = vmul.f32 %v1332_v54, %v457_v35  ;;  %v573_v44 = vmul.f32 %v1332_v54, %v458_v36  ;;  %v339_v48 = vsub.f32 %v187_v28, %v1321_v46 }
  0xe7   :  { %v1092_v49 = vpop.eup %1091  ;;  %903 = vst [vmem:[%s1903_s3 + $0x238] sm:$0xff] %v1090_v42  ;;  %1107 = vpow2.f32 %v752_v38  ;;  %v766_v50 = vmul.f32 1.442695, %v571_v39  ;;  %v340_v51 = vsub.f32 %v187_v28, %v1323_v47  ;;  %v453_v52 = vmul.f32 %v338_v40, %v338_v40  ;;  %v207_v28 = vpop.permute.xlu0 %206 }
  0xe8   :  { %v1094_v53 = vpop.eup %1093  ;;  %898 = vst [vmem:[%s1903_s3 + $0x210] sm:$0xff] %v1092_v49  ;;  %v768_v55 = vmul.f32 1.442695, %v572_v43  ;;  %v770_v56 = vmul.f32 1.442695, %v573_v44  ;;  %v454_v57 = vmul.f32 %v339_v48, %v339_v48  ;;  %v347_v58 = vsub.f32 %v202_v41, %v1319_v45 }
  0xe9   :  { %v1096_v59 = vpop.eup %1095  ;;  %899 = vst [vmem:[%s1903_s3 + $0x218] sm:$0xff] %v1094_v53  ;;  %1109 = vpow2.f32 %v766_v50  ;;  %v455_v60 = vmul.f32 %v340_v51, %v340_v51  ;;  %v568_v61 = vmul.f32 %v1332_v54, %v453_v52  ;;  %v348_v62 = vsub.f32 %v202_v41, %v1321_v46  ;;  %v222_v53 = vpop.permute.xlu1 %221 }
  0xea   :  { %900 = vst [vmem:[%s1903_s3 + $0x220] sm:$0xff] %v1096_v59  ;;  %1111 = vpow2.f32 %v768_v55  ;;  %v569_v0 = vmul.f32 %v1332_v54, %v454_v57  ;;  %v349_v1 = vsub.f32 %v202_v41, %v1323_v47  ;;  %v462_v2 = vmul.f32 %v347_v58, %v347_v58 }
  0xeb   :  { %1113 = vpow2.f32 %v770_v56  ;;  %v570_v3 = vmul.f32 %v1332_v54, %v455_v60  ;;  %v760_v4 = vmul.f32 1.442695, %v568_v61  ;;  %v463_v5 = vmul.f32 %v348_v62, %v348_v62 }
  0xec   :  { %v1098_v6 = vpop.eup %1097  ;;  %v762_v7 = vmul.f32 1.442695, %v569_v0  ;;  %v464_v8 = vmul.f32 %v349_v1, %v349_v1  ;;  %v577_v9 = vmul.f32 %v1332_v54, %v462_v2  ;;  %v344_v10 = vsub.f32 %v197_v63, %v1319_v45  ;;  %v217_v2 = vpop.permute.xlu0 %216 }
  0xed   :  { %v1100_v11 = vpop.eup %1099  ;;  %907 = vst [vmem:[%s1903_s3 + $0x258] sm:$0xff] %v1098_v6  ;;  %1115 = vpow2.f32 %v760_v4  ;;  %v764_v12 = vmul.f32 1.442695, %v570_v3  ;;  %v578_v13 = vmul.f32 %v1332_v54, %v463_v5  ;;  %v345_v14 = vsub.f32 %v197_v63, %v1321_v46 }
  0xee   :  { %v1102_v16 = vpop.eup %1101  ;;  %908 = vst [vmem:[%s1903_s3 + $0x260] sm:$0xff] %v1100_v11  ;;  %1117 = vpow2.f32 %v762_v7  ;;  %v579_v17 = vmul.f32 %v1332_v54, %v464_v8  ;;  %v778_v18 = vmul.f32 1.442695, %v577_v9  ;;  %v346_v19 = vsub.f32 %v197_v63, %v1323_v47 }
  0xef   :  { %v1104_v20 = vpop.eup %1103  ;;  %909 = vst [vmem:[%s1903_s3 + $0x268] sm:$0xff] %v1102_v16  ;;  %1119 = vpow2.f32 %v764_v12  ;;  %v780_v21 = vmul.f32 1.442695, %v578_v13  ;;  %v459_v22 = vmul.f32 %v344_v10, %v344_v10  ;;  %v460_v23 = vmul.f32 %v345_v14, %v345_v14 }
  0xf0   :  { %v1106_v24 = vpop.eup %1105  ;;  %904 = vst [vmem:[%s1903_s3 + $0x240] sm:$0xff] %v1104_v20  ;;  %1121 = vpow2.f32 %v778_v18  ;;  %v782_v25 = vmul.f32 1.442695, %v579_v17  ;;  %v461_v26 = vmul.f32 %v346_v19, %v346_v19  ;;  %v353_v27 = vsub.f32 %v212_v15, %v1319_v45 }
  0xf1   :  { %v1108_v29 = vpop.eup %1107  ;;  %905 = vst [vmem:[%s1903_s3 + $0x248] sm:$0xff] %v1106_v24  ;;  %1123 = vpow2.f32 %v780_v21  ;;  %v574_v30 = vmul.f32 %v1332_v54, %v459_v22  ;;  %v575_v31 = vmul.f32 %v1332_v54, %v460_v23  ;;  %v354_v32 = vsub.f32 %v212_v15, %v1321_v46 }
  0xf2   :  { %906 = vst [vmem:[%s1903_s3 + $0x250] sm:$0xff] %v1108_v29  ;;  %1125 = vpow2.f32 %v782_v25  ;;  %v576_v33 = vmul.f32 %v1332_v54, %v461_v26  ;;  %v355_v34 = vsub.f32 %v212_v15, %v1323_v47  ;;  %v468_v35 = vmul.f32 %v353_v27, %v353_v27  ;;  %v232_v15 = vpop.permute.xlu1 %231 }
  0xf3   :  { %v1110_v36 = vpop.eup %1109  ;;  %v772_v37 = vmul.f32 1.442695, %v574_v30  ;;  %v774_v38 = vmul.f32 1.442695, %v575_v31  ;;  %v469_v39 = vmul.f32 %v354_v32, %v354_v32  ;;  %v350_v40 = vsub.f32 %v207_v28, %v1319_v45 }
  0xf4   :  { %v1112_v41 = vpop.eup %1111  ;;  %913 = vst [vmem:[%s1903_s3 + $0x288] sm:$0xff] %v1110_v36  ;;  %v776_v42 = vmul.f32 1.442695, %v576_v33  ;;  %v470_v43 = vmul.f32 %v355_v34, %v355_v34  ;;  %v583_v44 = vmul.f32 %v1332_v54, %v468_v35  ;;  %v351_v48 = vsub.f32 %v207_v28, %v1321_v46  ;;  %v227_v36 = vpop.permute.xlu0 %226 }
  0xf5   :  { %v1114_v49 = vpop.eup %1113  ;;  %914 = vst [vmem:[%s1903_s3 + $0x290] sm:$0xff] %v1112_v41  ;;  %1127 = vpow2.f32 %v772_v37  ;;  %v584_v50 = vmul.f32 %v1332_v54, %v469_v39  ;;  %v352_v51 = vsub.f32 %v207_v28, %v1323_v47  ;;  %v465_v52 = vmul.f32 %v350_v40, %v350_v40 }
  0xf6   :  { %915 = vst [vmem:[%s1903_s3 + $0x298] sm:$0xff] %v1114_v49  ;;  %1129 = vpow2.f32 %v774_v38  ;;  %v585_v55 = vmul.f32 %v1332_v54, %v470_v43  ;;  %v790_v56 = vmul.f32 1.442695, %v583_v44  ;;  %v466_v57 = vmul.f32 %v351_v48, %v351_v48 }
  0xf7   :  { %v1116_v58 = vpop.eup %1115  ;;  %1131 = vpow2.f32 %v776_v42  ;;  %v792_v59 = vmul.f32 1.442695, %v584_v50  ;;  %v467_v60 = vmul.f32 %v352_v51, %v352_v51  ;;  %v580_v61 = vmul.f32 %v1332_v54, %v465_v52  ;;  %v242_v52 = vpop.permute.xlu1 %241 }
  0xf8   :  { %v1118_v62 = vpop.eup %1117  ;;  %910 = vst [vmem:[%s1903_s3 + $0x270] sm:$0xff] %v1116_v58  ;;  %1133 = vpow2.f32 %v790_v56  ;;  %v794_v63 = vmul.f32 1.442695, %v585_v55  ;;  %v581_v0 = vmul.f32 %v1332_v54, %v466_v57  ;;  %v359_v1 = vsub.f32 %v222_v53, %v1319_v45 }
  0xf9   :  { %v1120_v3 = vpop.eup %1119  ;;  %911 = vst [vmem:[%s1903_s3 + $0x278] sm:$0xff] %v1118_v62  ;;  %1135 = vpow2.f32 %v792_v59  ;;  %v582_v4 = vmul.f32 %v1332_v54, %v467_v60  ;;  %v784_v5 = vmul.f32 1.442695, %v580_v61  ;;  %v360_v6 = vsub.f32 %v222_v53, %v1321_v46 }
  0xfa   :  { %v1122_v7 = vpop.eup %1121  ;;  %912 = vst [vmem:[%s1903_s3 + $0x280] sm:$0xff] %v1120_v3  ;;  %1137 = vpow2.f32 %v794_v63  ;;  %v786_v8 = vmul.f32 1.442695, %v581_v0  ;;  %v361_v9 = vsub.f32 %v222_v53, %v1323_v47  ;;  %v474_v10 = vmul.f32 %v359_v1, %v359_v1 }
  0xfb   :  { %v1124_v11 = vpop.eup %1123  ;;  %919 = vst [vmem:[%s1903_s3 + $0x2b8] sm:$0xff] %v1122_v7  ;;  %1139 = vpow2.f32 %v784_v5  ;;  %v788_v12 = vmul.f32 1.442695, %v582_v4  ;;  %v475_v13 = vmul.f32 %v360_v6, %v360_v6  ;;  %v356_v14 = vsub.f32 %v217_v2, %v1319_v45  ;;  %v237_v7 = vpop.permute.xlu0 %236 }
  0xfc   :  { %v1126_v16 = vpop.eup %1125  ;;  %920 = vst [vmem:[%s1903_s3 + $0x2c0] sm:$0xff] %v1124_v11  ;;  %1141 = vpow2.f32 %v786_v8  ;;  %v476_v17 = vmul.f32 %v361_v9, %v361_v9  ;;  %v589_v18 = vmul.f32 %v1332_v54, %v474_v10  ;;  %v357_v19 = vsub.f32 %v217_v2, %v1321_v46 }
  0xfd   :  { %921 = vst [vmem:[%s1903_s3 + $0x2c8] sm:$0xff] %v1126_v16  ;;  %1143 = vpow2.f32 %v788_v12  ;;  %v590_v20 = vmul.f32 %v1332_v54, %v475_v13  ;;  %v358_v21 = vsub.f32 %v217_v2, %v1323_v47  ;;  %v471_v22 = vmul.f32 %v356_v14, %v356_v14 }
  0xfe   :  { %v591_v23 = vmul.f32 %v1332_v54, %v476_v17  ;;  %v802_v24 = vmul.f32 1.442695, %v589_v18  ;;  %v472_v25 = vmul.f32 %v357_v19, %v357_v19  ;;  %v365_v26 = vsub.f32 %v232_v15, %v1319_v45 }
  0xff   :  { %v1128_v27 = vpop.eup %1127  ;;  %v804_v28 = vmul.f32 1.442695, %v590_v20  ;;  %v473_v29 = vmul.f32 %v358_v21, %v358_v21  ;;  %v586_v30 = vmul.f32 %v1332_v54, %v471_v22  ;;  %v366_v31 = vsub.f32 %v232_v15, %v1321_v46 }
 0x100   :  { %v1130_v32 = vpop.eup %1129  ;;  %916 = vst [vmem:[%s1903_s3 + $0x2a0] sm:$0xff] %v1128_v27  ;;  %1145 = vpow2.f32 %v802_v24  ;;  %v806_v33 = vmul.f32 1.442695, %v591_v23  ;;  %v587_v34 = vmul.f32 %v1332_v54, %v472_v25  ;;  %v367_v35 = vsub.f32 %v232_v15, %v1323_v47 }
 0x101   :  { %v1132_v37 = vpop.eup %1131  ;;  %917 = vst [vmem:[%s1903_s3 + $0x2a8] sm:$0xff] %v1130_v32  ;;  %1147 = vpow2.f32 %v804_v28  ;;  %v588_v38 = vmul.f32 %v1332_v54, %v473_v29  ;;  %v796_v39 = vmul.f32 1.442695, %v586_v30  ;;  %v480_v40 = vmul.f32 %v365_v26, %v365_v26 }
 0x102   :  { %v1134_v41 = vpop.eup %1133  ;;  %918 = vst [vmem:[%s1903_s3 + $0x2b0] sm:$0xff] %v1132_v37  ;;  %1149 = vpow2.f32 %v806_v33  ;;  %v798_v42 = vmul.f32 1.442695, %v587_v34  ;;  %v481_v43 = vmul.f32 %v366_v31, %v366_v31  ;;  %v482_v44 = vmul.f32 %v367_v35, %v367_v35 }
 0x103   :  { %v1136_v48 = vpop.eup %1135  ;;  %925 = vst [vmem:[%s1903_s3 + $0x2e8] sm:$0xff] %v1134_v41  ;;  %1151 = vpow2.f32 %v796_v39  ;;  %v800_v49 = vmul.f32 1.442695, %v588_v38  ;;  %v595_v50 = vmul.f32 %v1332_v54, %v480_v40  ;;  %v362_v51 = vsub.f32 %v227_v36, %v1319_v45 }
 0x104   :  { %v1138_v53 = vpop.eup %1137  ;;  %926 = vst [vmem:[%s1903_s3 + $0x2f0] sm:$0xff] %v1136_v48  ;;  %1153 = vpow2.f32 %v798_v42  ;;  %v596_v55 = vmul.f32 %v1332_v54, %v481_v43  ;;  %v597_v56 = vmul.f32 %v1332_v54, %v482_v44  ;;  %v363_v57 = vsub.f32 %v227_v36, %v1321_v46 }
 0x105   :  { %v1140_v58 = vpop.eup %1139  ;;  %927 = vst [vmem:[%s1903_s3 + $0x2f8] sm:$0xff] %v1138_v53  ;;  %1155 = vpow2.f32 %v800_v49  ;;  %v814_v59 = vmul.f32 1.442695, %v595_v50  ;;  %v364_v60 = vsub.f32 %v227_v36, %v1323_v47  ;;  %v477_v61 = vmul.f32 %v362_v51, %v362_v51 }
 0x106   :  { %v1142_v62 = vpop.eup %1141  ;;  %922 = vst [vmem:[%s1903_s3 + $0x2d0] sm:$0xff] %v1140_v58  ;;  %v816_v63 = vmul.f32 1.442695, %v596_v55  ;;  %v818_v0 = vmul.f32 1.442695, %v597_v56  ;;  %v478_v1 = vmul.f32 %v363_v57, %v363_v57  ;;  %v371_v2 = vsub.f32 %v242_v52, %v1319_v45 }
 0x107   :  { %v1144_v3 = vpop.eup %1143  ;;  %923 = vst [vmem:[%s1903_s3 + $0x2d8] sm:$0xff] %v1142_v62  ;;  %1157 = vpow2.f32 %v814_v59  ;;  %v479_v4 = vmul.f32 %v364_v60, %v364_v60  ;;  %v592_v5 = vmul.f32 %v1332_v54, %v477_v61  ;;  %v372_v6 = vsub.f32 %v242_v52, %v1321_v46 }
 0x108   :  { %924 = vst [vmem:[%s1903_s3 + $0x2e0] sm:$0xff] %v1144_v3  ;;  %1159 = vpow2.f32 %v816_v63  ;;  %v593_v8 = vmul.f32 %v1332_v54, %v478_v1  ;;  %v373_v9 = vsub.f32 %v242_v52, %v1323_v47  ;;  %v486_v10 = vmul.f32 %v371_v2, %v371_v2 }
 0x109   :  { %1161 = vpow2.f32 %v818_v0  ;;  %v594_v11 = vmul.f32 %v1332_v54, %v479_v4  ;;  %v808_v12 = vmul.f32 1.442695, %v592_v5  ;;  %v487_v13 = vmul.f32 %v372_v6, %v372_v6 }
 0x10a   :  { %v1146_v14 = vpop.eup %1145  ;;  %v810_v15 = vmul.f32 1.442695, %v593_v8  ;;  %v488_v16 = vmul.f32 %v373_v9, %v373_v9  ;;  %v601_v17 = vmul.f32 %v1332_v54, %v486_v10  ;;  %v368_v18 = vsub.f32 %v237_v7, %v1319_v45 }
 0x10b   :  { %v1148_v19 = vpop.eup %1147  ;;  %931 = vst [vmem:[%s1903_s3 + $0x318] sm:$0xff] %v1146_v14  ;;  %1163 = vpow2.f32 %v808_v12  ;;  %v812_v20 = vmul.f32 1.442695, %v594_v11  ;;  %v602_v21 = vmul.f32 %v1332_v54, %v487_v13  ;;  %v369_v22 = vsub.f32 %v237_v7, %v1321_v46 }
 0x10c   :  { %v1150_v23 = vpop.eup %1149  ;;  %932 = vst [vmem:[%s1903_s3 + $0x320] sm:$0xff] %v1148_v19  ;;  %1165 = vpow2.f32 %v810_v15  ;;  %v603_v24 = vmul.f32 %v1332_v54, %v488_v16  ;;  %v826_v45 = vmul.f32 1.442695, %v601_v17  ;;  %v370_v25 = vsub.f32 %v237_v7, %v1323_v47 }
 0x10d   :  { %v1152_v26 = vpop.eup %1151  ;;  %933 = vst [vmem:[%s1903_s3 + $0x328] sm:$0xff] %v1150_v23  ;;  %1167 = vpow2.f32 %v812_v20  ;;  %v828_v27 = vmul.f32 1.442695, %v602_v21  ;;  %v483_v28 = vmul.f32 %v368_v18, %v368_v18  ;;  %v484_v46 = vmul.f32 %v369_v22, %v369_v22 }
 0x10e   :  { %v1154_v29 = vpop.eup %1153  ;;  %928 = vst [vmem:[%s1903_s3 + $0x300] sm:$0xff] %v1152_v26  ;;  %1169 = vpow2.f32 %v826_v45  ;;  %v830_v30 = vmul.f32 1.442695, %v603_v24  ;;  %v485_v31 = vmul.f32 %v370_v25, %v370_v25 }
 0x10f   :  { %v1156_v32 = vpop.eup %1155  ;;  %929 = vst [vmem:[%s1903_s3 + $0x308] sm:$0xff] %v1154_v29  ;;  %1171 = vpow2.f32 %v828_v27  ;;  %v598_v47 = vmul.f32 %v1332_v54, %v483_v28  ;;  %v599_v33 = vmul.f32 %v1332_v54, %v484_v46 }
 0x110   :  { %930 = vst [vmem:[%s1903_s3 + $0x310] sm:$0xff] %v1156_v32  ;;  %1173 = vpow2.f32 %v830_v30  ;;  %v600_v34 = vmul.f32 %v1332_v54, %v485_v31 }
 0x111   :  { %v1158_v35 = vpop.eup %1157  ;;  %v820_v36 = vmul.f32 1.442695, %v598_v47  ;;  %v822_v37 = vmul.f32 1.442695, %v599_v33 }
 0x112   :  { %v1160_v38 = vpop.eup %1159  ;;  %937 = vst [vmem:[%s1903_s3 + $0x348] sm:$0xff] %v1158_v35  ;;  %v824_v39 = vmul.f32 1.442695, %v600_v34 }
 0x113   :  { %v1162_v40 = vpop.eup %1161  ;;  %938 = vst [vmem:[%s1903_s3 + $0x350] sm:$0xff] %v1160_v38  ;;  %1175 = vpow2.f32 %v820_v36 }
 0x114   :  { %939 = vst [vmem:[%s1903_s3 + $0x358] sm:$0xff] %v1162_v40  ;;  %1177 = vpow2.f32 %v822_v37 }
 0x115   :  { %v1164_v54 = vpop.eup %1163  ;;  %1179 = vpow2.f32 %v824_v39 }
 0x116   :  { %v1166_v41 = vpop.eup %1165  ;;  %934 = vst [vmem:[%s1903_s3 + $0x330] sm:$0xff] %v1164_v54 }
 0x117   :  { %v1168_v42 = vpop.eup %1167  ;;  %935 = vst [vmem:[%s1903_s3 + $0x338] sm:$0xff] %v1166_v41 }
 0x118   :  { %v1170_v43 = vpop.eup %1169  ;;  %936 = vst [vmem:[%s1903_s3 + $0x340] sm:$0xff] %v1168_v42 }
 0x119   :  { %v1172_v44 = vpop.eup %1171  ;;  %943 = vst [vmem:[%s1903_s3 + $0x378] sm:$0xff] %v1170_v43 }
 0x11a   :  { %v1174_v48 = vpop.eup %1173  ;;  %944 = vst [vmem:[%s1903_s3 + $0x380] sm:$0xff] %v1172_v44 }
 0x11b   :  { %945 = vst [vmem:[%s1903_s3 + $0x388] sm:$0xff] %v1174_v48 }
 0x11d   :  { %v1176_v49 = vpop.eup %1175 }
 0x11e   :  { %v1178_v50 = vpop.eup %1177  ;;  %940 = vst [vmem:[%s1903_s3 + $0x360] sm:$0xff] %v1176_v49 }
 0x11f   :  { %v1180_v51 = vpop.eup %1179  ;;  %941 = vst [vmem:[%s1903_s3 + $0x368] sm:$0xff] %v1178_v50 }
 0x120   :  { %942 = vst [vmem:[%s1903_s3 + $0x370] sm:$0xff] %v1180_v51 }

</bundles_post_ra>
